<compile_context>
chip_gen: v6e
topology: v6e:2x2x1
jax: 0.10.0
libtpu: 0.0.40
codegen_flags: <defaults>
</compile_context>

<pallas_src>
import math

import jax
import jax.numpy as jnp
import numpy as np
from jax import lax
from jax.experimental import pallas as pl

# ---------------- problem sizes (small, consistent with the module) ----------------
B = 2            # batch
SX = 16          # x sequence length
SL = 8           # latent sequence length
E = 32           # embedding_dim == latent_dim
H = 32           # hidden_size
NH = 4           # n_heads
DH = H // NH     # dim_head
SKV = SX + SL    # per-batch kv length
NX = B * SX      # 32 x rows in the folded slab
NL = B * SL      # 16 latent rows (== query rows == output rows)
NKV = NX + NL    # 48 kv rows in the folded slab

LN_EPS = 1e-5                    # torch.nn.LayerNorm default
RMS_EPS = 1e-8                   # RMSNorm eps
SQRT_DH = math.sqrt(DH)
INV_SQRT_DH = 1.0 / math.sqrt(DH)
FMIN = float(np.finfo(np.float32).min)


# ---------------------------------- kernel ----------------------------------
def perceiver_attention_kernel(
    rows_ref,    # (NKV, E)   raw rows: [x batch-major ; latents batch-major]
    lng_ref,     # (NKV, E)   per-row LayerNorm gamma (ln_x rows, then ln_latents rows)
    lnb_ref,     # (NKV, E)   per-row LayerNorm beta
    bias_ref,    # (NL, NKV)  block-diagonal additive attention bias
    m2_ref,      # (2H, 2H)   0/1 head-block indicator for RMS sum-of-squares
    rmsg_ref,    # (1, 2H)    RMSNorm gamma tiled over all Q and K head columns
    wqkv_ref,    # (E, 3H)    fused [Wq.T | Wk.T | Wv.T]
    wproj_ref,   # (H, E)     projector weight, transposed
    o_ref,       # (NL, E)
):
    # --- one LayerNorm over the whole 48-row slab (per-row gamma/beta) ---
    rows = rows_ref[...]
    mu = jnp.mean(rows, axis=-1, keepdims=True)
    xc = rows - mu
    var = jnp.mean(xc * xc, axis=-1, keepdims=True)
    normed = xc * lax.rsqrt(var + LN_EPS) * lng_ref[...] + lnb_ref[...]      # (NKV, E)

    # --- one fused Q/K/V projection (batch and q/k/v folded into one MXU op) ---
    qkv = jnp.dot(normed, wqkv_ref[...],
                  preferred_element_type=jnp.float32)                        # (NKV, 3H)

    # --- lane-dense RMSNorm over all Q and K columns at once ---
    qk = qkv[:, :2 * H]                                                      # (NKV, 2H)
    ssq = jnp.dot(qk * qk, m2_ref[...],
                  preferred_element_type=jnp.float32)                        # per-head ssq, broadcast per column
    inv = jnp.minimum(lax.rsqrt(ssq) * SQRT_DH, 1.0 / RMS_EPS)               # == 1 / clamp(||v||*DH^-0.5, eps)
    qkn = qk * inv * rmsg_ref[...]                                           # (NKV, 2H)
    # NOTE: K reuses query_norm's gamma on purpose (bug in the reference module reproduced).

    q = qkn[NX:, :H]          # (NL, H)   latent rows only (sublane-aligned slice)
    k = qkn[:, H:]            # (NKV, H)
    v = qkv[:, 2 * H:]        # (NKV, H)
    bias = bias_ref[...]      # (NL, NKV)

    # --- per-head attention core, batch already folded into the rows ---
    ys = []
    for h in range(NH):       # static unroll, NH = 4
        c0, c1 = h * DH, (h + 1) * DH
        s = jnp.einsum("qd,kd->qk", q[:, c0:c1], k[:, c0:c1],
                       preferred_element_type=jnp.float32) * INV_SQRT_DH     # (NL, NKV)
        s = s + bias
        m = jnp.max(s, axis=-1, keepdims=True)                               # finite: every row has 24 finite cols
        e = jnp.exp(s - m)                                                   # cross-batch cols: exp(-inf) == 0
        l = jnp.sum(e, axis=-1, keepdims=True)                               # >= 1
        pv = jnp.dot(e, v[:, c0:c1], preferred_element_type=jnp.float32)     # (NL, DH)
        ys.append(pv / l)                                                    # exact softmax normalization, post-PV

    y = jnp.concatenate(ys, axis=-1)                                         # (NL, H)

    # --- single fused output projection, written straight to the output ---
    o_ref[...] = jnp.dot(y, wproj_ref[...],
                         preferred_element_type=jnp.float32).astype(o_ref.dtype)


# --------------------------------- wrapper ----------------------------------
def perceiver_attention(x, latents, mask_x, mask_latent, params):
    # Fold batch into rows: [x rows (batch-major) ; latent rows (batch-major)].
    rows = jnp.concatenate([x.reshape(NX, E), latents.reshape(NL, E)], axis=0)

    # Per-row LayerNorm gamma/beta slabs (x rows use ln_x, latent rows use ln_latents).
    lng = jnp.concatenate([jnp.broadcast_to(params["ln_x_g"], (NX, E)),
                           jnp.broadcast_to(params["ln_l_g"], (NL, E))], axis=0)
    lnb = jnp.concatenate([jnp.broadcast_to(params["ln_x_b"], (NX, E)),
                           jnp.broadcast_to(params["ln_l_b"], (NL, E))], axis=0)

    # Batch-folded additive attention bias (NL, NKV):
    #  * same-batch entries: (1 - mask) * FMIN  — identical to the module,
    #  * cross-batch entries: -inf (strictly below FMIN so fully masked query rows
    #    still softmax uniformly over their OWN 24 keys, matching the reference).
    # Combined with jnp.where, never summed -> no -inf - -inf NaN path.
    q_batch = jnp.repeat(jnp.arange(B), SL)                           # (NL,)
    k_batch = jnp.concatenate([jnp.repeat(jnp.arange(B), SX),
                               jnp.repeat(jnp.arange(B), SL)])        # (NKV,)
    same = q_batch[:, None] == k_batch[None, :]                       # (NL, NKV)
    q_mask = mask_latent.reshape(NL)
    k_mask = jnp.concatenate([mask_x.reshape(NX), mask_latent.reshape(NL)])
    pair = q_mask[:, None] * k_mask[None, :]                          # (NL, NKV)
    bias = jnp.where(same, (1.0 - pair) * FMIN, -jnp.inf).astype(jnp.float32)

    # 0/1 head-block indicator for the lane-dense per-head sum-of-squares (constant).
    head = np.arange(2 * H) // DH
    m2 = jnp.asarray((head[:, None] == head[None, :]).astype(np.float32))   # (2H, 2H)

    # RMSNorm gamma tiled across every Q and K head column.
    rmsg = jnp.tile(params["rms_g"], 2 * NH).reshape(1, 2 * H)

    # Fused projection weight [Wq.T | Wk.T | Wv.T]  (to_KV already emits K then V).
    wqkv = jnp.concatenate([params["Wq"].T, params["Wkv"].T], axis=1)        # (E, 3H)
    wproj = params["Wproj"].T                                                # (H, E)

    out_flat = pl.pallas_call(
        perceiver_attention_kernel,
        out_shape=jax.ShapeDtypeStruct((NL, E), jnp.float32),
        # Gridless single invocation: total resident data < 50 KB, no scratch,
        # no BlockSpecs / pipelining needed on any of v5e / v6e / v7x.
    )(rows, lng, lnb, bias, m2, rmsg, wqkv, wproj)
    return out_flat.reshape(B, SL, E)


# ----------------------------- pure-JAX reference -----------------------------
def reference(x, latents, mask_x, mask_latent, params):
    def layernorm(v, g, b):
        mu = jnp.mean(v, axis=-1, keepdims=True)
        var = jnp.mean((v - mu) ** 2, axis=-1, keepdims=True)
        return (v - mu) / jnp.sqrt(var + LN_EPS) * g + b

    xn = layernorm(x, params["ln_x_g"], params["ln_x_b"])
    ln = layernorm(latents, params["ln_l_g"], params["ln_l_b"])

    q = ln @ params["Wq"].T                                   # (B, SL, H)
    kv_in = jnp.concatenate([xn, ln], axis=1)                 # (B, SKV, E)
    kv_mask = jnp.concatenate([mask_x, mask_latent], axis=1)  # (B, SKV)
    kv = kv_in @ params["Wkv"].T
    k, v = kv[..., :H], kv[..., H:]

    def to_heads(t):
        return t.reshape(t.shape[0], t.shape[1], NH, DH).transpose(0, 2, 1, 3)

    qh, kh, vh = to_heads(q), to_heads(k), to_heads(v)

    def rmsn(t):
        nrm = jnp.sqrt(jnp.sum(t * t, axis=-1, keepdims=True)) * DH ** (-0.5)
        return t / jnp.maximum(nrm, RMS_EPS) * params["rms_g"]

    qh, kh = rmsn(qh), rmsn(kh)                               # module bug: key uses query_norm
    s = qh @ kh.transpose(0, 1, 3, 2) / math.sqrt(DH)         # (B, NH, SL, SKV)
    mask = kv_mask[:, None, :] * mask_latent[:, :, None]      # (B, SL, SKV)
    s = s + (1.0 - mask)[:, None, :, :] * FMIN
    p = jax.nn.softmax(s, axis=-1)
    y = p @ vh                                                # (B, NH, SL, DH)
    y = y.transpose(0, 2, 1, 3).reshape(B, SL, H)
    return y @ params["Wproj"].T


# ----------------------------------- main ------------------------------------
if __name__ == "__main__":
    key = jax.random.PRNGKey(0)
    ks = jax.random.split(key, 12)

    x = jax.random.normal(ks[0], (B, SX, E), jnp.float32)
    latents = jax.random.normal(ks[1], (B, SL, E), jnp.float32)

    # deterministic 0/1 masks with a few zeros
    mask_x = (jax.random.uniform(ks[2], (B, SX)) > 0.25).astype(jnp.float32)
    mask_latent = (jax.random.uniform(ks[3], (B, SL)) > 0.1).astype(jnp.float32)

    params = {
        "ln_x_g": 1.0 + 0.1 * jax.random.normal(ks[4], (E,), jnp.float32),
        "ln_x_b": 0.1 * jax.random.normal(ks[5], (E,), jnp.float32),
        "ln_l_g": 1.0 + 0.1 * jax.random.normal(ks[6], (E,), jnp.float32),
        "ln_l_b": 0.1 * jax.random.normal(ks[7], (E,), jnp.float32),
        "Wq": 0.05 * jax.random.normal(ks[8], (H, E), jnp.float32),
        "Wkv": 0.05 * jax.random.normal(ks[9], (2 * H, E), jnp.float32),
        "rms_g": 1.0 + 0.1 * jax.random.normal(ks[10], (DH,), jnp.float32),
        "Wproj": 0.05 * jax.random.normal(ks[11], (E, H), jnp.float32),
    }

    out = perceiver_attention(x, latents, mask_x, mask_latent, params)
    out = jax.block_until_ready(out)

    ref = reference(x, latents, mask_x, mask_latent, params)
    np.testing.assert_allclose(np.asarray(out), np.asarray(ref),
                               rtol=1e-3, atol=1e-3)
    print("KERNEL_OK")
</pallas_src>

<mosaic_0001>
module attributes {stable_mosaic.version = 11 : i64} {
  func.func @perceiver_attention_kernel(%arg0: memref<48x32xf32, #tpu.memory_space<vmem>>, %arg1: memref<48x32xf32, #tpu.memory_space<vmem>>, %arg2: memref<48x32xf32, #tpu.memory_space<vmem>>, %arg3: memref<16x48xf32, #tpu.memory_space<vmem>>, %arg4: memref<64x64xf32, #tpu.memory_space<vmem>>, %arg5: memref<1x64xf32, #tpu.memory_space<vmem>>, %arg6: memref<32x96xf32, #tpu.memory_space<vmem>>, %arg7: memref<32x32xf32, #tpu.memory_space<vmem>>, %arg8: memref<16x32xf32, #tpu.memory_space<vmem>>) attributes {dimension_semantics = [], scalar_prefetch = 0 : i64, scratch_operands = 0 : i64, tpu.core_type = #tpu.core_type<tc>} {
    %c0 = arith.constant 0 : index
    %c0_0 = arith.constant 0 : index
    %0 = vector.load %arg0[%c0, %c0_0] : memref<48x32xf32, #tpu.memory_space<vmem>>, vector<48x32xf32>
    %cst = arith.constant dense<0.000000e+00> : vector<48xf32>
    %1 = vector.multi_reduction <add>, %0, %cst [1] : vector<48x32xf32> to vector<48xf32>
    %2 = vector.shape_cast %1 : vector<48xf32> to vector<48x1xf32>
    %cst_1 = arith.constant 3.200000e+01 : f32
    %3 = vector.broadcast %cst_1 : f32 to vector<48x1xf32>
    %4 = arith.divf %2, %3 : vector<48x1xf32>
    %5 = vector.broadcast %4 : vector<48x1xf32> to vector<48x32xf32>
    %6 = arith.subf %0, %5 : vector<48x32xf32>
    %7 = arith.mulf %6, %6 : vector<48x32xf32>
    %cst_2 = arith.constant dense<0.000000e+00> : vector<48xf32>
    %8 = vector.multi_reduction <add>, %7, %cst_2 [1] : vector<48x32xf32> to vector<48xf32>
    %9 = vector.shape_cast %8 : vector<48xf32> to vector<48x1xf32>
    %cst_3 = arith.constant 3.200000e+01 : f32
    %10 = vector.broadcast %cst_3 : f32 to vector<48x1xf32>
    %11 = arith.divf %9, %10 : vector<48x1xf32>
    %cst_4 = arith.constant 9.99999974E-6 : f32
    %12 = vector.broadcast %cst_4 : f32 to vector<48x1xf32>
    %13 = arith.addf %11, %12 : vector<48x1xf32>
    %14 = math.rsqrt %13 : vector<48x1xf32>
    %15 = vector.broadcast %14 : vector<48x1xf32> to vector<48x32xf32>
    %16 = arith.mulf %6, %15 : vector<48x32xf32>
    %c0_5 = arith.constant 0 : index
    %c0_6 = arith.constant 0 : index
    %17 = vector.load %arg1[%c0_5, %c0_6] : memref<48x32xf32, #tpu.memory_space<vmem>>, vector<48x32xf32>
    %18 = arith.mulf %16, %17 : vector<48x32xf32>
    %c0_7 = arith.constant 0 : index
    %c0_8 = arith.constant 0 : index
    %19 = vector.load %arg2[%c0_7, %c0_8] : memref<48x32xf32, #tpu.memory_space<vmem>>, vector<48x32xf32>
    %20 = arith.addf %18, %19 : vector<48x32xf32>
    %c0_9 = arith.constant 0 : index
    %c0_10 = arith.constant 0 : index
    %21 = vector.load %arg6[%c0_9, %c0_10] : memref<32x96xf32, #tpu.memory_space<vmem>>, vector<32x96xf32>
    %cst_11 = arith.constant dense<0.000000e+00> : vector<48x96xf32>
    %22 = tpu.matmul %20, %21, %cst_11 {dimension_numbers = #tpu.dot_dimension_numbers<[1], [0], [0], [1], [0, 0, 1, 1], [], []>} : vector<48x32xf32>, vector<32x96xf32>, vector<48x96xf32> -> vector<48x96xf32>
    %23 = vector.extract_strided_slice %22 {offsets = [0, 0], sizes = [48, 64], strides = [1, 1]} : vector<48x96xf32> to vector<48x64xf32>
    %24 = arith.mulf %23, %23 : vector<48x64xf32>
    %c0_12 = arith.constant 0 : index
    %c0_13 = arith.constant 0 : index
    %25 = vector.load %arg4[%c0_12, %c0_13] : memref<64x64xf32, #tpu.memory_space<vmem>>, vector<64x64xf32>
    %cst_14 = arith.constant dense<0.000000e+00> : vector<48x64xf32>
    %26 = tpu.matmul %24, %25, %cst_14 {dimension_numbers = #tpu.dot_dimension_numbers<[1], [0], [0], [1], [0, 0, 1, 1], [], []>} : vector<48x64xf32>, vector<64x64xf32>, vector<48x64xf32> -> vector<48x64xf32>
    %27 = math.rsqrt %26 : vector<48x64xf32>
    %cst_15 = arith.constant 2.82842708 : f32
    %28 = vector.broadcast %cst_15 : f32 to vector<48x64xf32>
    %29 = arith.mulf %27, %28 : vector<48x64xf32>
    %cst_16 = arith.constant 1.000000e+08 : f32
    %30 = vector.broadcast %cst_16 : f32 to vector<48x64xf32>
    %31 = arith.minimumf %29, %30 : vector<48x64xf32>
    %32 = arith.mulf %23, %31 : vector<48x64xf32>
    %c0_17 = arith.constant 0 : index
    %c0_18 = arith.constant 0 : index
    %33 = vector.load %arg5[%c0_17, %c0_18] : memref<1x64xf32, #tpu.memory_space<vmem>>, vector<1x64xf32>
    %34 = vector.broadcast %33 : vector<1x64xf32> to vector<48x64xf32>
    %35 = arith.mulf %32, %34 : vector<48x64xf32>
    %36 = vector.extract_strided_slice %35 {offsets = [32, 0], sizes = [16, 32], strides = [1, 1]} : vector<48x64xf32> to vector<16x32xf32>
    %37 = vector.extract_strided_slice %35 {offsets = [0, 32], sizes = [48, 32], strides = [1, 1]} : vector<48x64xf32> to vector<48x32xf32>
    %38 = vector.extract_strided_slice %22 {offsets = [0, 64], sizes = [48, 32], strides = [1, 1]} : vector<48x96xf32> to vector<48x32xf32>
    %c0_19 = arith.constant 0 : index
    %c0_20 = arith.constant 0 : index
    %39 = vector.load %arg3[%c0_19, %c0_20] : memref<16x48xf32, #tpu.memory_space<vmem>>, vector<16x48xf32>
    %40 = vector.extract_strided_slice %36 {offsets = [0, 0], sizes = [16, 8], strides = [1, 1]} : vector<16x32xf32> to vector<16x8xf32>
    %41 = vector.extract_strided_slice %37 {offsets = [0, 0], sizes = [48, 8], strides = [1, 1]} : vector<48x32xf32> to vector<48x8xf32>
    "tpu.trace_start"() <{level = 10 : i32, message = "qd,kd->qk"}> : () -> ()
    %cst_21 = arith.constant dense<0.000000e+00> : vector<16x48xf32>
    %42 = tpu.matmul %40, %41, %cst_21 {dimension_numbers = #tpu.dot_dimension_numbers<[1], [1], [0], [0], [0, 0, 1, 0], [], []>} : vector<16x8xf32>, vector<48x8xf32>, vector<16x48xf32> -> vector<16x48xf32>
    "tpu.trace_stop"() : () -> ()
    %cst_22 = arith.constant 0.353553385 : f32
    %43 = vector.broadcast %cst_22 : f32 to vector<16x48xf32>
    %44 = arith.mulf %42, %43 : vector<16x48xf32>
    %45 = arith.addf %44, %39 : vector<16x48xf32>
    %cst_23 = arith.constant dense<0xFF800000> : vector<16xf32>
    %46 = vector.multi_reduction <maximumf>, %45, %cst_23 [1] : vector<16x48xf32> to vector<16xf32>
    %47 = vector.shape_cast %46 : vector<16xf32> to vector<16x1xf32>
    %48 = vector.broadcast %47 : vector<16x1xf32> to vector<16x48xf32>
    %49 = arith.subf %45, %48 : vector<16x48xf32>
    %50 = math.exp %49 : vector<16x48xf32>
    %cst_24 = arith.constant dense<0.000000e+00> : vector<16xf32>
    %51 = vector.multi_reduction <add>, %50, %cst_24 [1] : vector<16x48xf32> to vector<16xf32>
    %52 = vector.shape_cast %51 : vector<16xf32> to vector<16x1xf32>
    %53 = vector.extract_strided_slice %38 {offsets = [0, 0], sizes = [48, 8], strides = [1, 1]} : vector<48x32xf32> to vector<48x8xf32>
    %cst_25 = arith.constant dense<0.000000e+00> : vector<16x8xf32>
    %54 = tpu.matmul %50, %53, %cst_25 {dimension_numbers = #tpu.dot_dimension_numbers<[1], [0], [0], [1], [0, 0, 1, 1], [], []>} : vector<16x48xf32>, vector<48x8xf32>, vector<16x8xf32> -> vector<16x8xf32>
    %55 = vector.broadcast %52 : vector<16x1xf32> to vector<16x8xf32>
    %56 = arith.divf %54, %55 : vector<16x8xf32>
    %57 = vector.extract_strided_slice %36 {offsets = [0, 8], sizes = [16, 8], strides = [1, 1]} : vector<16x32xf32> to vector<16x8xf32>
    %58 = vector.extract_strided_slice %37 {offsets = [0, 8], sizes = [48, 8], strides = [1, 1]} : vector<48x32xf32> to vector<48x8xf32>
    "tpu.trace_start"() <{level = 10 : i32, message = "qd,kd->qk"}> : () -> ()
    %cst_26 = arith.constant dense<0.000000e+00> : vector<16x48xf32>
    %59 = tpu.matmul %57, %58, %cst_26 {dimension_numbers = #tpu.dot_dimension_numbers<[1], [1], [0], [0], [0, 0, 1, 0], [], []>} : vector<16x8xf32>, vector<48x8xf32>, vector<16x48xf32> -> vector<16x48xf32>
    "tpu.trace_stop"() : () -> ()
    %cst_27 = arith.constant 0.353553385 : f32
    %60 = vector.broadcast %cst_27 : f32 to vector<16x48xf32>
    %61 = arith.mulf %59, %60 : vector<16x48xf32>
    %62 = arith.addf %61, %39 : vector<16x48xf32>
    %cst_28 = arith.constant dense<0xFF800000> : vector<16xf32>
    %63 = vector.multi_reduction <maximumf>, %62, %cst_28 [1] : vector<16x48xf32> to vector<16xf32>
    %64 = vector.shape_cast %63 : vector<16xf32> to vector<16x1xf32>
    %65 = vector.broadcast %64 : vector<16x1xf32> to vector<16x48xf32>
    %66 = arith.subf %62, %65 : vector<16x48xf32>
    %67 = math.exp %66 : vector<16x48xf32>
    %cst_29 = arith.constant dense<0.000000e+00> : vector<16xf32>
    %68 = vector.multi_reduction <add>, %67, %cst_29 [1] : vector<16x48xf32> to vector<16xf32>
    %69 = vector.shape_cast %68 : vector<16xf32> to vector<16x1xf32>
    %70 = vector.extract_strided_slice %38 {offsets = [0, 8], sizes = [48, 8], strides = [1, 1]} : vector<48x32xf32> to vector<48x8xf32>
    %cst_30 = arith.constant dense<0.000000e+00> : vector<16x8xf32>
    %71 = tpu.matmul %67, %70, %cst_30 {dimension_numbers = #tpu.dot_dimension_numbers<[1], [0], [0], [1], [0, 0, 1, 1], [], []>} : vector<16x48xf32>, vector<48x8xf32>, vector<16x8xf32> -> vector<16x8xf32>
    %72 = vector.broadcast %69 : vector<16x1xf32> to vector<16x8xf32>
    %73 = arith.divf %71, %72 : vector<16x8xf32>
    %74 = vector.extract_strided_slice %36 {offsets = [0, 16], sizes = [16, 8], strides = [1, 1]} : vector<16x32xf32> to vector<16x8xf32>
    %75 = vector.extract_strided_slice %37 {offsets = [0, 16], sizes = [48, 8], strides = [1, 1]} : vector<48x32xf32> to vector<48x8xf32>
    "tpu.trace_start"() <{level = 10 : i32, message = "qd,kd->qk"}> : () -> ()
    %cst_31 = arith.constant dense<0.000000e+00> : vector<16x48xf32>
    %76 = tpu.matmul %74, %75, %cst_31 {dimension_numbers = #tpu.dot_dimension_numbers<[1], [1], [0], [0], [0, 0, 1, 0], [], []>} : vector<16x8xf32>, vector<48x8xf32>, vector<16x48xf32> -> vector<16x48xf32>
    "tpu.trace_stop"() : () -> ()
    %cst_32 = arith.constant 0.353553385 : f32
    %77 = vector.broadcast %cst_32 : f32 to vector<16x48xf32>
    %78 = arith.mulf %76, %77 : vector<16x48xf32>
    %79 = arith.addf %78, %39 : vector<16x48xf32>
    %cst_33 = arith.constant dense<0xFF800000> : vector<16xf32>
    %80 = vector.multi_reduction <maximumf>, %79, %cst_33 [1] : vector<16x48xf32> to vector<16xf32>
    %81 = vector.shape_cast %80 : vector<16xf32> to vector<16x1xf32>
    %82 = vector.broadcast %81 : vector<16x1xf32> to vector<16x48xf32>
    %83 = arith.subf %79, %82 : vector<16x48xf32>
    %84 = math.exp %83 : vector<16x48xf32>
    %cst_34 = arith.constant dense<0.000000e+00> : vector<16xf32>
    %85 = vector.multi_reduction <add>, %84, %cst_34 [1] : vector<16x48xf32> to vector<16xf32>
    %86 = vector.shape_cast %85 : vector<16xf32> to vector<16x1xf32>
    %87 = vector.extract_strided_slice %38 {offsets = [0, 16], sizes = [48, 8], strides = [1, 1]} : vector<48x32xf32> to vector<48x8xf32>
    %cst_35 = arith.constant dense<0.000000e+00> : vector<16x8xf32>
    %88 = tpu.matmul %84, %87, %cst_35 {dimension_numbers = #tpu.dot_dimension_numbers<[1], [0], [0], [1], [0, 0, 1, 1], [], []>} : vector<16x48xf32>, vector<48x8xf32>, vector<16x8xf32> -> vector<16x8xf32>
    %89 = vector.broadcast %86 : vector<16x1xf32> to vector<16x8xf32>
    %90 = arith.divf %88, %89 : vector<16x8xf32>
    %91 = vector.extract_strided_slice %36 {offsets = [0, 24], sizes = [16, 8], strides = [1, 1]} : vector<16x32xf32> to vector<16x8xf32>
    %92 = vector.extract_strided_slice %37 {offsets = [0, 24], sizes = [48, 8], strides = [1, 1]} : vector<48x32xf32> to vector<48x8xf32>
    "tpu.trace_start"() <{level = 10 : i32, message = "qd,kd->qk"}> : () -> ()
    %cst_36 = arith.constant dense<0.000000e+00> : vector<16x48xf32>
    %93 = tpu.matmul %91, %92, %cst_36 {dimension_numbers = #tpu.dot_dimension_numbers<[1], [1], [0], [0], [0, 0, 1, 0], [], []>} : vector<16x8xf32>, vector<48x8xf32>, vector<16x48xf32> -> vector<16x48xf32>
    "tpu.trace_stop"() : () -> ()
    %cst_37 = arith.constant 0.353553385 : f32
    %94 = vector.broadcast %cst_37 : f32 to vector<16x48xf32>
    %95 = arith.mulf %93, %94 : vector<16x48xf32>
    %96 = arith.addf %95, %39 : vector<16x48xf32>
    %cst_38 = arith.constant dense<0xFF800000> : vector<16xf32>
    %97 = vector.multi_reduction <maximumf>, %96, %cst_38 [1] : vector<16x48xf32> to vector<16xf32>
    %98 = vector.shape_cast %97 : vector<16xf32> to vector<16x1xf32>
    %99 = vector.broadcast %98 : vector<16x1xf32> to vector<16x48xf32>
    %100 = arith.subf %96, %99 : vector<16x48xf32>
    %101 = math.exp %100 : vector<16x48xf32>
    %cst_39 = arith.constant dense<0.000000e+00> : vector<16xf32>
    %102 = vector.multi_reduction <add>, %101, %cst_39 [1] : vector<16x48xf32> to vector<16xf32>
    %103 = vector.shape_cast %102 : vector<16xf32> to vector<16x1xf32>
    %104 = vector.extract_strided_slice %38 {offsets = [0, 24], sizes = [48, 8], strides = [1, 1]} : vector<48x32xf32> to vector<48x8xf32>
    %cst_40 = arith.constant dense<0.000000e+00> : vector<16x8xf32>
    %105 = tpu.matmul %101, %104, %cst_40 {dimension_numbers = #tpu.dot_dimension_numbers<[1], [0], [0], [1], [0, 0, 1, 1], [], []>} : vector<16x48xf32>, vector<48x8xf32>, vector<16x8xf32> -> vector<16x8xf32>
    %106 = vector.broadcast %103 : vector<16x1xf32> to vector<16x8xf32>
    %107 = arith.divf %105, %106 : vector<16x8xf32>
    %108 = tpu.concatenate %56, %73, %90, %107 in 1 : vector<16x8xf32>, vector<16x8xf32>, vector<16x8xf32>, vector<16x8xf32> -> vector<16x32xf32>
    %c0_41 = arith.constant 0 : index
    %c0_42 = arith.constant 0 : index
    %109 = vector.load %arg7[%c0_41, %c0_42] : memref<32x32xf32, #tpu.memory_space<vmem>>, vector<32x32xf32>
    %cst_43 = arith.constant dense<0.000000e+00> : vector<16x32xf32>
    %110 = tpu.matmul %108, %109, %cst_43 {dimension_numbers = #tpu.dot_dimension_numbers<[1], [0], [0], [1], [0, 0, 1, 1], [], []>} : vector<16x32xf32>, vector<32x32xf32>, vector<16x32xf32> -> vector<16x32xf32>
    %c0_44 = arith.constant 0 : index
    %c0_45 = arith.constant 0 : index
    %111 = vector.load %arg8[%c0_44, %c0_45] : memref<16x32xf32, #tpu.memory_space<vmem>>, vector<16x32xf32>
    tpu.vector_store %arg8[%c0_44, %c0_45], %110 {strides = array<i32>} : memref<16x32xf32, #tpu.memory_space<vmem>>, vector<16x32xf32>,
    return
  }
}

</mosaic_0001>

<bundles_post_ra>
// kernel: tpu_custom_call.1
= control target key start
LH: loop header
LB: loop body
LE: loop exit
PB: predicated region body
PF: predicated region fallthrough
CT: control target
= control target key end

     0   :  { %vm36_vm0 = vcmask 261120   ;;  %s2381_s0 = inlined_call_operand.vmem [shape: f32[48,32], index: 0, kind: input, shape index: {}]   ;;  %s2382_s1 = inlined_call_operand.vmem [shape: f32[48,32], index: 1, kind: input, shape index: {}]   ;;  %s2383_s2 = inlined_call_operand.vmem [shape: f32[48,32], index: 2, kind: input, shape index: {}]   ;;  %s2384_s3 = inlined_call_operand.vmem [shape: f32[16,48], index: 3, kind: input, shape index: {}]   ;;  %s2385_s4 = inlined_call_operand.vmem [shape: f32[64,64], index: 4, kind: input, shape index: {}]   ;;  %s2386_s5 = inlined_call_operand.vmem [shape: f32[1,64], index: 5, kind: input, shape index: {}]   ;;  %s2387_s6 = inlined_call_operand.vmem [shape: f32[32,96], index: 6, kind: input, shape index: {}]   ;;  %s2388_s7 = inlined_call_operand.vmem [shape: f32[32,32], index: 7, kind: input, shape index: {}]   ;;  %s2389_s8 = inlined_call_operand.hbm [shape: f32[16,32], index: 8, kind: output, shape index: {}]  }
   0x1   :  { %v30_v0 = vld [vmem:[%s2381_s0] sm:$0xff]  ;;  %v32_v1 = vld [vmem:[%s2381_s0 + $0x10] sm:$0xff]  ;;  %v31_v2 = vld [vmem:[%s2381_s0 + $0x8] sm:$0xff] }
   0x2   :  { %v37_v3 = vsel %vm36_vm0, %v30_v0, 0.0  ;;  %v43_v4 = vsel %vm36_vm0, %v32_v1, 0.0  ;;  %v33_v5 = vld [vmem:[%s2381_s0 + $0x18] sm:$0xff] }
   0x3   :  { %38 = vadd.xlane.f32.xlu0 %v37_v3  ;;  %44 = vadd.xlane.f32.xlu1 %v43_v4 }
   0x4   :  { %13 = vsyncpa [#allocation3], 0  ;;  %v40_v6 = vsel %vm36_vm0, %v31_v2, 0.0  ;;  %v46_v7 = vsel %vm36_vm0, %v33_v5, 0.0  ;;  %v34_v8 = vld [vmem:[%s2381_s0 + $0x20] sm:$0xff]  ;;  %v35_v9 = vld [vmem:[%s2381_s0 + $0x28] sm:$0xff] }
   0x5   :  { %v49_v10 = vsel %vm36_vm0, %v34_v8, 0.0  ;;  %v52_v11 = vsel %vm36_vm0, %v35_v9, 0.0  ;;  %v143_v42 = vld [vmem:[%s2387_s6 + $0x18] sm:$0xff]  ;;  %v142_v43 = vld [vmem:[%s2387_s6 + $0x10] sm:$0xff]  ;;  %v141_v44 = vld [vmem:[%s2387_s6 + $0x8] sm:$0xff]  ;;  %vm271_vm1 = vcmask 523264  }
   0x6   :  { %1646 = vmatprep.subr.mxu0 %v143_v42  ;;  %v140_v45 = vld [vmem:[%s2387_s6] sm:$0xff]  ;;  %v270_v46 = vld [vmem:[%s2385_s4 + $0x38] sm:$0xff]  ;;  %v269_v47 = vld [vmem:[%s2385_s4 + $0x30] sm:$0xff]  ;;  %vm442_vm2 = vcmask 64512   ;;  %s1913_s16 = smov 96   ;;  %vm538_vm3 = vcmask 392192  }
   0x7   :  { %41 = vadd.xlane.f32.xlu0 %v40_v6  ;;  %47 = vadd.xlane.f32.xlu1 %v46_v7  ;;  %v268_v48 = vld [vmem:[%s2385_s4 + $0x28] sm:$0xff]  ;;  %v267_v49 = vld [vmem:[%s2385_s4 + $0x20] sm:$0xff]  ;;  %v266_v50 = vld [vmem:[%s2385_s4 + $0x18] sm:$0xff]  ;;  %s1915_s20 = smov 88   ;;  %s1917_s21 = smov 56   ;;  %vm1388_vm4 = vcmask 130048  }
   0x8   :  { %1647 = vmatpush3.msra.mxu0 %v143_v42  ;;  %1663 = vmatprep.subr.mxu1 %v270_v46  ;;  %v116_v6 = vld [vmem:[%s2382_s1] sm:$0xff]  ;;  %v265_v42 = vld [vmem:[%s2385_s4 + $0x10] sm:$0xff]  ;;  %s1918_s22 = smov 80   ;;  %s1919_s23 = smov 112   ;;  %vm1391_vm5 = vcmask 195584  }
   0x9   :  { %1648 = vmatprep.subr.mxu0 %v142_v43  ;;  %1664 = vmatpush3.msra.mxu1 %v270_v46  ;;  %s1920_s24 = smov 48   ;;  %s1921_s25 = smov 72  }
   0xa   :  { %1649 = vmatpush3.msra.mxu0 %v142_v43  ;;  %1665 = vmatprep.subr.mxu1 %v269_v47  ;;  %v263_v43 = vld [vmem:[%s2385_s4] sm:$0xff]  ;;  %s1922_s26 = smov 104   ;;  %s1923_s27 = smov 40  }
   0xb   :  { %50 = vadd.xlane.f32.xlu0 %v49_v10  ;;  %53 = vadd.xlane.f32.xlu1 %v52_v11  ;;  %v117_v11 = vld [vmem:[%s2382_s1 + $0x8] sm:$0xff]  ;;  %s1924_s28 = smov 8   ;;  %s1925_s29 = smov 16  }
   0xc   :  { %1650 = vmatprep.subr.mxu0 %v141_v44  ;;  %1666 = vmatpush3.msra.mxu1 %v269_v47 }
   0xd   :  { %1651 = vmatpush3.msra.mxu0 %v141_v44  ;;  %1667 = vmatprep.subr.mxu1 %v268_v48 }
   0xe   :  { %1652 = vmatprep.subr.mxu0 %v140_v45  ;;  %1668 = vmatpush3.msra.mxu1 %v268_v48 }
   0xf   :  { %1653 = vmatpush3.msra.mxu0 %v140_v45  ;;  %1669 = vmatprep.subr.mxu1 %v267_v49 }
  0x10   :  { %1670 = vmatpush3.msra.mxu1 %v267_v49 }
  0x11   :  { %1671 = vmatprep.subr.mxu1 %v266_v50 }
  0x12   :  { %1672 = vmatpush3.msra.mxu1 %v266_v50 }
  0x13   :  { %1673 = vmatprep.subr.mxu1 %v265_v42 }
  0x14   :  { %1674 = vmatpush3.msra.mxu1 %v265_v42 }
  0x8c   :  { %v39_v12 = vpop.xlane.xlu0 %38  ;;  %v45_v13 = vpop.xlane.xlu1 %44 }
  0x8d   :  { %v56_v14 = vmul.f32 0.03125, %v39_v12  ;;  %v58_v15 = vmul.f32 0.03125, %v45_v13 }
  0x8f   :  { %v1998_v16 = vsub.f32 %v30_v0, %v56_v14  ;;  %v2000_v17 = vsub.f32 %v32_v1, %v58_v15  ;;  %v118_v15 = vld [vmem:[%s2382_s1 + $0x10] sm:$0xff] }
  0x90   :  { %v42_v18 = vpop.xlane.xlu0 %41  ;;  %v48_v19 = vpop.xlane.xlu1 %47 }
  0x91   :  { %v57_v20 = vmul.f32 0.03125, %v42_v18  ;;  %v59_v21 = vmul.f32 0.03125, %v48_v19  ;;  %v68_v22 = vmul.f32 %v1998_v16, %v1998_v16  ;;  %v70_v23 = vmul.f32 %v2000_v17, %v2000_v17 }
  0x93   :  { %v2006_v24 = vsub.f32 %v31_v2, %v57_v20  ;;  %v2008_v25 = vsub.f32 %v33_v5, %v59_v21  ;;  %v74_v26 = vsel %vm36_vm0, %v68_v22, 0.0  ;;  %v80_v29 = vsel %vm36_vm0, %v70_v23, 0.0  ;;  %v130_v20 = vld [vmem:[%s2383_s2 + $0x10] sm:$0xff]  ;;  %v119_v23 = vld [vmem:[%s2382_s1 + $0x18] sm:$0xff] }
  0x94   :  { %75 = vadd.xlane.f32.xlu0 %v74_v26  ;;  %v51_v27 = vpop.xlane.xlu0 %50  ;;  %v54_v28 = vpop.xlane.xlu1 %53 }
  0x95   :  { %v60_v30 = vmul.f32 0.03125, %v51_v27  ;;  %v61_v31 = vmul.f32 0.03125, %v54_v28  ;;  %v69_v32 = vmul.f32 %v2006_v24, %v2006_v24  ;;  %v71_v33 = vmul.f32 %v2008_v25, %v2008_v25 }
  0x97   :  { %v2016_v34 = vsub.f32 %v34_v8, %v60_v30  ;;  %v2018_v35 = vsub.f32 %v35_v9, %v61_v31  ;;  %v77_v36 = vsel %vm36_vm0, %v69_v32, 0.0  ;;  %v83_v37 = vsel %vm36_vm0, %v71_v33, 0.0  ;;  %v128_v8 = vld [vmem:[%s2383_s2] sm:$0xff] }
  0x98   :  { %81 = vadd.xlane.f32.xlu0 %v80_v29  ;;  %78 = vadd.xlane.f32.xlu1 %v77_v36  ;;  %v131_v29 = vld [vmem:[%s2383_s2 + $0x18] sm:$0xff]  ;;  %v132_v32 = vld [vmem:[%s2383_s2 + $0x20] sm:$0xff]  ;;  %v121_v36 = vld [vmem:[%s2382_s1 + $0x28] sm:$0xff] }
  0x99   :  { %v72_v38 = vmul.f32 %v2016_v34, %v2016_v34  ;;  %v73_v39 = vmul.f32 %v2018_v35, %v2018_v35 }
  0x9b   :  { %v86_v40 = vsel %vm36_vm0, %v72_v38, 0.0  ;;  %v89_v41 = vsel %vm36_vm0, %v73_v39, 0.0 }
  0x9c   :  { %84 = vadd.xlane.f32.xlu1 %v83_v37  ;;  %87 = vadd.xlane.f32.xlu0 %v86_v40 }
  0xa0   :  { %90 = vadd.xlane.f32.xlu1 %v89_v41 }
 0x11d   :  { %v76_v51 = vpop.xlane.xlu0 %75 }
 0x11e   :  { %v92_v52 = vmul.f32 0.03125, %v76_v51 }
 0x120   :  { %v98_v53 = vadd.f32 1e-05, %v92_v52 }
 0x121   :  { %v79_v54 = vpop.xlane.xlu1 %78  ;;  %v82_v55 = vpop.xlane.xlu0 %81 }
 0x122   :  { %1835 = vrsqrt.f32 %v98_v53  ;;  %v93_v56 = vmul.f32 0.03125, %v79_v54  ;;  %v94_v57 = vmul.f32 0.03125, %v82_v55 }
 0x124   :  { %v99_v58 = vadd.f32 1e-05, %v93_v56  ;;  %v100_v59 = vadd.f32 1e-05, %v94_v57 }
 0x125   :  { %v85_v60 = vpop.xlane.xlu1 %84  ;;  %v88_v61 = vpop.xlane.xlu0 %87 }
 0x126   :  { %1837 = vrsqrt.f32 %v99_v58  ;;  %v95_v62 = vmul.f32 0.03125, %v85_v60  ;;  %v96_v63 = vmul.f32 0.03125, %v88_v61 }
 0x127   :  { %1839 = vrsqrt.f32 %v100_v59 }
 0x128   :  { %v101_v0 = vadd.f32 1e-05, %v95_v62  ;;  %v102_v1 = vadd.f32 1e-05, %v96_v63 }
 0x129   :  { %v91_v2 = vpop.xlane.xlu1 %90 }
 0x12a   :  { %1841 = vrsqrt.f32 %v101_v0  ;;  %v97_v3 = vmul.f32 0.03125, %v91_v2 }
 0x12b   :  { %1843 = vrsqrt.f32 %v102_v1 }
 0x12c   :  { %v103_v4 = vadd.f32 1e-05, %v97_v3 }
 0x12e   :  { %1845 = vrsqrt.f32 %v103_v4 }
 0x12f   :  { %v1836_v5 = vpop.eup %1835 }
 0x130   :  { %v110_v7 = vmul.f32 %v1836_v5, %v1998_v16  ;;  %v129_v16 = vld [vmem:[%s2383_s2 + $0x8] sm:$0xff] }
 0x132   :  { %v122_v9 = vmul.f32 %v116_v6, %v110_v7 }
 0x133   :  { %v1838_v10 = vpop.eup %1837 }
 0x134   :  { %v1840_v12 = vpop.eup %1839  ;;  %v134_v13 = vadd.f32 %v128_v8, %v122_v9  ;;  %v111_v14 = vmul.f32 %v1838_v10, %v2006_v24 }
 0x135   :  { %v112_v18 = vmul.f32 %v1840_v12, %v2000_v17  ;;  %v120_v17 = vld [vmem:[%s2382_s1 + $0x20] sm:$0xff] }
 0x136   :  { %1654 = vmatprep.mubr.msk.f32.mxu0 %vm36_vm0, %v134_v13  ;;  %v123_v19 = vmul.f32 %v117_v11, %v111_v14  ;;  %v1509_v14 = vld [vmem:[%s2386_s5] ss:$0 sm:$0xff]  ;;  %s1914_s5 = smov 64  }
 0x137   :  { %v1842_v21 = vpop.eup %1841  ;;  %v124_v22 = vmul.f32 %v118_v15, %v112_v18 }
 0x138   :  { %v1844_v24 = vpop.eup %1843  ;;  %v135_v26 = vadd.f32 %v129_v16, %v123_v19  ;;  %v113_v27 = vmul.f32 %v1842_v21, %v2008_v25 }
 0x139   :  { %v136_v28 = vadd.f32 %v130_v20, %v124_v22  ;;  %v114_v30 = vmul.f32 %v1844_v24, %v2016_v34  ;;  %v133_v34 = vld [vmem:[%s2383_s2 + $0x28] sm:$0xff]  ;;  %s1926_s2 = smov 24  }
 0x13a   :  { %1655 = vmatmul.mubr.msk.f32.vlgmr.msra.gmra.mxu0 %vm36_vm0, %v135_v26  ;;  %v125_v31 = vmul.f32 %v119_v23, %v113_v27 }
 0x13b   :  { %v1846_v33 = vpop.eup %1845  ;;  %1657 = vmatprep.mubr.msk.f32.mxu0 %vm36_vm0, %v136_v28  ;;  %v126_v25 = vmul.f32 %v120_v17, %v114_v30 }
 0x13c   :  { %v137_v37 = vadd.f32 %v131_v29, %v125_v31  ;;  %v115_v38 = vmul.f32 %v1846_v33, %v2018_v35  ;;  %v264_v35 = vld [vmem:[%s2385_s4 + $0x8] sm:$0xff] }
 0x13d   :  { %v138_v39 = vadd.f32 %v132_v32, %v126_v25  ;;  %1675 = vmatprep.subr.mxu1 %v264_v35 }
 0x13e   :  { %1658 = vmatmul.mubr.msk.f32.gmra.mxu0 %vm36_vm0, %v137_v37  ;;  %v127_v40 = vmul.f32 %v121_v36, %v115_v38  ;;  %1676 = vmatpush3.msra.mxu1 %v264_v35  ;;  %v2194_v35 = vld [vmem:[%s2384_s3 + $0x8] sm:$0xff] }
 0x13f   :  { %1660 = vmatprep.mubr.msk.f32.mxu0 %vm36_vm0, %v138_v39  ;;  %1677 = vmatprep.subr.mxu1 %v263_v43 }
 0x140   :  { %v139_v41 = vadd.f32 %v133_v34, %v127_v40  ;;  %1678 = vmatpush3.msra.mxu1 %v263_v43 }
 0x142   :  { %1661 = vmatmul.mubr.msk.f32.gmra.mxu0 %vm36_vm0, %v139_v41 }
 0x1fa   :  { %v2112_v44 = vpop.f32.mrf.mxu0 }
 0x1fb   :  { %v258_v48 = vmul.f32 %v2112_v44, %v2112_v44 }
 0x1fc   :  { %v2114_v45 = vpop.f32.mrf.mxu0 }
 0x1fd   :  { %v257_v46 = vmul.f32 %v2114_v45, %v2114_v45 }
 0x1fe   :  { %v2118_v47 = vpop.f32.mrf.mxu0 }
 0x1ff   :  { %1679 = vmatprep.mubr.msk.f32.mxu1 %vm271_vm1, %v257_v46  ;;  %v260_v52 = vmul.f32 %v2118_v47, %v2118_v47 }
 0x200   :  { %v2123_v49 = vpop.f32.mrf.mxu0  ;;  %1680 = vmatmul.mubr.msk.f32.vlgmr.msra.gmra.mxu1 %vm271_vm1, %v258_v48  ;;  %v2199_v48 = vld [vmem:[%s2384_s3] sm:$0xff]  ;;  %s1916_s3 = smov 120  }
 0x201   :  { %v259_v50 = vmul.f32 %v2123_v49, %v2123_v49 }
 0x202   :  { %v2128_v51 = vpop.f32.mrf.mxu0 }
 0x203   :  { %1682 = vmatprep.mubr.msk.f32.mxu1 %vm271_vm1, %v259_v50  ;;  %v262_v55 = vmul.f32 %v2128_v51, %v2128_v51 }
 0x204   :  { %v2133_v53 = vpop.f32.mrf.mxu0  ;;  %1683 = vmatmul.mubr.msk.f32.gmra.mxu1 %vm271_vm1, %v260_v52 }
 0x205   :  { %v261_v54 = vmul.f32 %v2133_v53, %v2133_v53 }
 0x207   :  { %1685 = vmatprep.mubr.msk.f32.mxu1 %vm271_vm1, %v261_v54 }
 0x208   :  { %1686 = vmatmul.mubr.msk.f32.gmra.mxu1 %vm271_vm1, %v262_v55 }
 0x2c0   :  { %v1681_v56 = vpop.f32.mrf.mxu1 }
 0x2c1   :  { %1847 = vrsqrt.f32 %v1681_v56 }
 0x2c2   :  { %v356_v57 = vpop.f32.mrf.mxu1 }
 0x2c4   :  { %v1684_v58 = vpop.f32.mrf.mxu1 }
 0x2c5   :  { %1849 = vrsqrt.f32 %v1684_v58 }
 0x2c6   :  { %v366_v59 = vpop.f32.mrf.mxu1 }
 0x2c8   :  { %v1687_v60 = vpop.f32.mrf.mxu1 }
 0x2c9   :  { %1851 = vrsqrt.f32 %v1687_v60 }
 0x2ca   :  { %1853 = vrsqrt.f32 %v366_v59  ;;  %v376_v61 = vpop.f32.mrf.mxu1 }
 0x2cb   :  { %1855 = vrsqrt.f32 %v376_v61 }
 0x2cc   :  { %1857 = vrsqrt.f32 %v356_v57 }
 0x2ce   :  { %v1848_v62 = vpop.eup %1847 }
 0x2cf   :  { %v392_v0 = vmul.f32 2.828427, %v1848_v62 }
 0x2d1   :  { %v398_v6 = vmin.f32 %v392_v0, 1e+08 }
 0x2d2   :  { %v1850_v63 = vpop.eup %1849 }
 0x2d3   :  { %v394_v3 = vmul.f32 2.828427, %v1850_v63  ;;  %v404_v15 = vmul.f32 %v2112_v44, %v398_v6 }
 0x2d5   :  { %v400_v9 = vmin.f32 %v394_v3, 1e+08  ;;  %v2157_v23 = vmul.f32 %v1509_v14, %v404_v15 }
 0x2d6   :  { %v1852_v1 = vpop.eup %1851 }
 0x2d7   :  { %v1854_v2 = vpop.eup %1853  ;;  %v396_v4 = vmul.f32 2.828427, %v1852_v1  ;;  %v406_v20 = vmul.f32 %v2118_v47, %v400_v9 }
 0x2d8   :  { %v1856_v5 = vpop.eup %1855  ;;  %v393_v10 = vmul.f32 2.828427, %v1854_v2 }
 0x2d9   :  { %v402_v7 = vmin.f32 %v396_v4, 1e+08  ;;  %v395_v8 = vmul.f32 2.828427, %v1856_v5  ;;  %v1858_v13 = vpop.eup %1857  ;;  %v2161_v27 = vmul.f32 %v1509_v14, %v406_v20 }
 0x2da   :  { %v391_v19 = vmul.f32 2.828427, %v1858_v13  ;;  %v399_v21 = vmin.f32 %v393_v10, 1e+08 }
 0x2db   :  { %v408_v11 = vmul.f32 %v2128_v51, %v402_v7  ;;  %v401_v12 = vmin.f32 %v395_v8, 1e+08 }
 0x2dc   :  { %v397_v24 = vmin.f32 %v391_v19, 1e+08  ;;  %v405_v26 = vmul.f32 %v399_v21, %v2123_v49 }
 0x2dd   :  { %v2147_v16 = vmul.f32 %v1509_v14, %v408_v11  ;;  %v407_v18 = vmul.f32 %v401_v12, %v2133_v53 }
 0x2de   :  { %v403_v17 = vmul.f32 %v397_v24, %v2114_v45  ;;  %v2166_v28 = vmul.f32 %v1509_v14, %v405_v26 }
 0x2df   :  { %v2151_v22 = vmul.f32 %v1509_v14, %v407_v18  ;;  %440 = vrot.lane.b32.xlu0 %v2147_v16, %s1913_s16 }
 0x2e0   :  { %v2170_v29 = vmul.f32 %v1509_v14, %v403_v17 }
 0x2e1   :  { %438 = vrot.lane.b32.xlu1 %v2151_v22, %s1913_s16  ;;  %1700 = vmatprep.mubr.msk.f32.mxu0 %vm442_vm2, %v2151_v22 }
 0x2e3   :  { %432 = vrot.lane.b32.xlu0 %v2157_v23, %s1913_s16 }
 0x2e5   :  { %436 = vrot.lane.b32.xlu1 %v2161_v27, %s1913_s16 }
 0x2e7   :  { %573 = vrot.lane.b32.xlu0 %v2128_v51, %s1914_s5 }
 0x2e9   :  { %434 = vrot.lane.b32.xlu1 %v2166_v28, %s1913_s16 }
 0x2eb   :  { %569 = vrot.lane.b32.xlu0 %v2118_v47, %s1914_s5 }
 0x2ed   :  { %430 = vrot.lane.b32.xlu1 %v2170_v29, %s1913_s16 }
 0x2ef   :  { %565 = vrot.lane.b32.xlu0 %v2112_v44, %s1914_s5 }
 0x2f1   :  { %571 = vrot.lane.b32.xlu1 %v2133_v53, %s1914_s5 }
 0x2f5   :  { %567 = vrot.lane.b32.xlu1 %v2123_v49, %s1914_s5 }
 0x2f9   :  { %563 = vrot.lane.b32.xlu1 %v2114_v45, %s1914_s5 }
 0x351   :  { %v441_v30 = vpop.permute.xlu0 %440 }
 0x352   :  { %1688 = vmatprep.subr.msk.mxu0 %vm442_vm2, %v441_v30 }
 0x353   :  { %1689 = vmatpush3.xpose.msk.msra.mxu0 %vm442_vm2, %v441_v30  ;;  %v439_v31 = vpop.permute.xlu1 %438 }
 0x354   :  { %1690 = vmatprep.subr.msk.mxu0 %vm442_vm2, %v439_v31 }
 0x355   :  { %v433_v32 = vpop.permute.xlu0 %432 }
 0x357   :  { %1691 = vmatpush3.xpose.msk.msra.mxu0 %vm442_vm2, %v439_v31  ;;  %v437_v33 = vpop.permute.xlu1 %436 }
 0x358   :  { %1692 = vmatprep.subr.msk.mxu0 %vm442_vm2, %v437_v33 }
 0x359   :  { %v574_v25 = vpop.permute.xlu0 %573 }
 0x35a   :  { %1703 = vmatprep.subr.mxu1 %v574_v25 }
 0x35b   :  { %1693 = vmatpush3.xpose.msk.msra.mxu0 %vm442_vm2, %v437_v33  ;;  %1704 = vmatpush3.msra.mxu1 %v574_v25  ;;  %v435_v36 = vpop.permute.xlu1 %434 }
 0x35c   :  { %1694 = vmatprep.subr.msk.mxu0 %vm442_vm2, %v435_v36 }
 0x35d   :  { %v570_v38 = vpop.permute.xlu0 %569 }
 0x35f   :  { %1695 = vmatpush3.xpose.msk.msra.mxu0 %vm442_vm2, %v435_v36  ;;  %v431_v37 = vpop.permute.xlu1 %430 }
 0x360   :  { %1696 = vmatprep.subr.msk.mxu0 %vm442_vm2, %v433_v32 }
 0x361   :  { %v566_v40 = vpop.permute.xlu0 %565 }
 0x363   :  { %1697 = vmatpush3.xpose.msk.msra.mxu0 %vm442_vm2, %v433_v32  ;;  %v572_v39 = vpop.permute.xlu1 %571 }
 0x364   :  { %1698 = vmatprep.subr.msk.mxu0 %vm442_vm2, %v431_v37  ;;  %1705 = vmatprep.subr.mxu1 %v572_v39 }
 0x365   :  { %1706 = vmatpush3.msra.mxu1 %v572_v39 }
 0x366   :  { %1707 = vmatprep.subr.mxu1 %v570_v38 }
 0x367   :  { %1699 = vmatpush3.xpose.msk.msra.mxu0 %vm442_vm2, %v431_v37  ;;  %1708 = vmatpush3.msra.mxu1 %v570_v38  ;;  %v568_v34 = vpop.permute.xlu1 %567 }
 0x368   :  { %1709 = vmatprep.subr.mxu1 %v568_v34 }
 0x369   :  { %1710 = vmatpush3.msra.mxu1 %v568_v34 }
 0x36a   :  { %1701 = vmatmul.mubr.msk.f32.vlgmr.msra.gmra.mxu0 %vm442_vm2, %v2147_v16  ;;  %1711 = vmatprep.subr.mxu1 %v566_v40 }
 0x36b   :  { %1712 = vmatpush3.msra.mxu1 %v566_v40  ;;  %v564_v41 = vpop.permute.xlu1 %563 }
 0x36c   :  { %1713 = vmatprep.subr.mxu1 %v564_v41 }
 0x36d   :  { %1714 = vmatpush3.msra.mxu1 %v564_v41 }
 0x42a   :  { %v1702_v42 = vpop.f32.mrf.mxu0 }
 0x42b   :  { %v535_v43 = vmul.f32 0.35355338, %v1702_v42 }
 0x42c   :  { %v525_v46 = vpop.f32.mrf.mxu0 }
 0x42d   :  { %v534_v50 = vmul.f32 0.35355338, %v525_v46  ;;  %v537_v52 = vadd.f32 %v535_v43, %v2194_v35 }
 0x42f   :  { %v542_v54 = vsel %vm538_vm3, %v537_v52, -inf  ;;  %v536_v55 = vadd.f32 %v534_v50, %v2199_v48 }
 0x430   :  { %543 = vmax.xlane.f32.xlu1 %v542_v54 }
 0x431   :  { %v539_v56 = vsel %vm538_vm3, %v536_v55, -inf }
 0x432   :  { %540 = vmax.xlane.f32.xlu0 %v539_v56 }
 0x441   :  { %678 = vrot.lane.b32.xlu1 %v2151_v22, %s1915_s20 }
 0x445   :  { %674 = vrot.lane.b32.xlu1 %v2166_v28, %s1915_s20 }
 0x448   :  { %680 = vrot.lane.b32.xlu0 %v2147_v16, %s1915_s20 }
 0x449   :  { %670 = vrot.lane.b32.xlu1 %v2170_v29, %s1915_s20 }
 0x44c   :  { %676 = vrot.lane.b32.xlu0 %v2161_v27, %s1915_s20 }
 0x44d   :  { %668 = vrot.lane.b32.xlu1 %v2147_v16, %s1916_s3 }
 0x450   :  { %672 = vrot.lane.b32.xlu0 %v2157_v23, %s1915_s20 }
 0x451   :  { %803 = vrot.lane.b32.xlu1 %v2133_v53, %s1917_s21 }
 0x454   :  { %666 = vrot.lane.b32.xlu0 %v2151_v22, %s1916_s3 }
 0x455   :  { %799 = vrot.lane.b32.xlu1 %v2123_v49, %s1917_s21 }
 0x458   :  { %805 = vrot.lane.b32.xlu0 %v2128_v51, %s1917_s21 }
 0x459   :  { %795 = vrot.lane.b32.xlu1 %v2114_v45, %s1917_s21 }
 0x45c   :  { %801 = vrot.lane.b32.xlu0 %v2118_v47, %s1917_s21 }
 0x460   :  { %797 = vrot.lane.b32.xlu0 %v2112_v44, %s1917_s21 }
 0x4b9   :  { %v544_v57 = vpop.xlane.xlu1 %543 }
 0x4ba   :  { %v546_v58 = vsub.f32 %v537_v52, %v544_v57 }
 0x4bb   :  { %v541_v59 = vpop.xlane.xlu0 %540 }
 0x4bc   :  { %v545_v60 = vsub.f32 %v536_v55, %v541_v59  ;;  %v549_v61 = vmul.f32 1.442695, %v546_v58 }
 0x4bd   :  { %v679_v62 = vpop.permute.xlu1 %678 }
 0x4be   :  { %v547_v63 = vmul.f32 1.442695, %v545_v60 }
 0x4bf   :  { %v681_v0 = vpop.permute.xlu0 %680 }
 0x4c0   :  { %1859 = vpow2.f32 %v547_v63  ;;  %1718 = vmatprep.subr.msk.mxu1 %vm442_vm2, %v681_v0 }
 0x4c1   :  { %1861 = vpow2.f32 %v549_v61  ;;  %v675_v1 = vpop.permute.xlu1 %674 }
 0x4c3   :  { %v677_v2 = vpop.permute.xlu0 %676 }
 0x4c5   :  { %v671_v3 = vpop.permute.xlu1 %670 }
 0x4c7   :  { %v673_v4 = vpop.permute.xlu0 %672 }
 0x4c9   :  { %v669_v5 = vpop.permute.xlu1 %668 }
 0x4cb   :  { %v667_v6 = vpop.permute.xlu0 %666 }
 0x4cd   :  { %v2220_v7 = vpop.eup %1859  ;;  %v804_v9 = vpop.permute.xlu1 %803 }
 0x4ce   :  { %v2222_v8 = vpop.eup %1861  ;;  %1715 = vmatprep.mubr.msk.f32.mxu1 %vm538_vm3, %v2220_v7 }
 0x4cf   :  { %1716 = vmatmul.mubr.msk.f32.vlgmr.msra.gmra.mxu1 %vm538_vm3, %v2222_v8  ;;  %v806_v10 = vpop.permute.xlu0 %805 }
 0x4d0   :  { %1719 = vmatpush3.xpose.msk.msra.mxu1 %vm442_vm2, %v681_v0  ;;  %1730 = vmatprep.mubr.msk.f32.mxu1 %vm442_vm2, %v667_v6 }
 0x4d1   :  { %1720 = vmatprep.subr.msk.mxu1 %vm442_vm2, %v679_v62  ;;  %1733 = vmatprep.subr.mxu0 %v806_v10  ;;  %v800_v12 = vpop.permute.xlu1 %799 }
 0x4d2   :  { %1734 = vmatpush3.msra.mxu0 %v806_v10 }
 0x4d3   :  { %1735 = vmatprep.subr.mxu0 %v804_v9  ;;  %v802_v11 = vpop.permute.xlu0 %801 }
 0x4d4   :  { %1721 = vmatpush3.xpose.msk.msra.mxu1 %vm442_vm2, %v679_v62  ;;  %1736 = vmatpush3.msra.mxu0 %v804_v9 }
 0x4d5   :  { %1722 = vmatprep.subr.msk.mxu1 %vm442_vm2, %v677_v2  ;;  %1737 = vmatprep.subr.mxu0 %v802_v11  ;;  %v796_v14 = vpop.permute.xlu1 %795 }
 0x4d6   :  { %1738 = vmatpush3.msra.mxu0 %v802_v11 }
 0x4d7   :  { %1739 = vmatprep.subr.mxu0 %v800_v12  ;;  %v798_v13 = vpop.permute.xlu0 %797 }
 0x4d8   :  { %1723 = vmatpush3.xpose.msk.msra.mxu1 %vm442_vm2, %v677_v2  ;;  %1740 = vmatpush3.msra.mxu0 %v800_v12 }
 0x4d9   :  { %1724 = vmatprep.subr.msk.mxu1 %vm442_vm2, %v675_v1  ;;  %1741 = vmatprep.subr.mxu0 %v798_v13 }
 0x4da   :  { %1742 = vmatpush3.msra.mxu0 %v798_v13 }
 0x4db   :  { %1743 = vmatprep.subr.mxu0 %v796_v14 }
 0x4dc   :  { %1725 = vmatpush3.xpose.msk.msra.mxu1 %vm442_vm2, %v675_v1  ;;  %1744 = vmatpush3.msra.mxu0 %v796_v14 }
 0x4dd   :  { %1726 = vmatprep.subr.msk.mxu1 %vm442_vm2, %v673_v4 }
 0x4e0   :  { %1727 = vmatpush3.xpose.msk.msra.mxu1 %vm442_vm2, %v673_v4 }
 0x4e1   :  { %1728 = vmatprep.subr.msk.mxu1 %vm442_vm2, %v671_v3 }
 0x4e4   :  { %1729 = vmatpush3.xpose.msk.msra.mxu1 %vm442_vm2, %v671_v3 }
 0x4e7   :  { %1731 = vmatmul.mubr.msk.f32.vlgmr.msra.gmra.mxu1 %vm442_vm2, %v669_v5 }
 0x58f   :  { %v2241_v15 = vpop.f32.mrf.mxu1 }
 0x591   :  { %v2243_v18 = vpop.f32.mrf.mxu1 }
 0x5a7   :  { %v1732_v19 = vpop.f32.mrf.mxu1 }
 0x5a8   :  { %v774_v20 = vmul.f32 0.35355338, %v1732_v19 }
 0x5a9   :  { %v764_v21 = vpop.f32.mrf.mxu1 }
 0x5aa   :  { %v773_v24 = vmul.f32 0.35355338, %v764_v21  ;;  %v776_v26 = vadd.f32 %v774_v20, %v2194_v35 }
 0x5ac   :  { %v780_v17 = vsel %vm538_vm3, %v776_v26, -inf  ;;  %v775_v30 = vadd.f32 %v773_v24, %v2199_v48 }
 0x5ad   :  { %781 = vmax.xlane.f32.xlu1 %v780_v17 }
 0x5ae   :  { %v777_v31 = vsel %vm538_vm3, %v775_v30, -inf }
 0x5af   :  { %778 = vmax.xlane.f32.xlu0 %v777_v31 }
 0x5be   :  { %910 = vrot.lane.b32.xlu1 %v2151_v22, %s1918_s22 }
 0x5c2   :  { %906 = vrot.lane.b32.xlu1 %v2166_v28, %s1918_s22 }
 0x5c5   :  { %912 = vrot.lane.b32.xlu0 %v2147_v16, %s1918_s22 }
 0x5c6   :  { %902 = vrot.lane.b32.xlu1 %v2170_v29, %s1918_s22 }
 0x5c9   :  { %908 = vrot.lane.b32.xlu0 %v2161_v27, %s1918_s22 }
 0x5ca   :  { %900 = vrot.lane.b32.xlu1 %v2147_v16, %s1919_s23 }
 0x5cd   :  { %904 = vrot.lane.b32.xlu0 %v2157_v23, %s1918_s22 }
 0x5ce   :  { %1035 = vrot.lane.b32.xlu1 %v2133_v53, %s1920_s24 }
 0x5d1   :  { %898 = vrot.lane.b32.xlu0 %v2151_v22, %s1919_s23 }
 0x5d2   :  { %1031 = vrot.lane.b32.xlu1 %v2123_v49, %s1920_s24 }
 0x5d5   :  { %1037 = vrot.lane.b32.xlu0 %v2128_v51, %s1920_s24 }
 0x5d6   :  { %1027 = vrot.lane.b32.xlu1 %v2114_v45, %s1920_s24 }
 0x5d9   :  { %1033 = vrot.lane.b32.xlu0 %v2118_v47, %s1920_s24 }
 0x5dd   :  { %1029 = vrot.lane.b32.xlu0 %v2112_v44, %s1920_s24 }
 0x636   :  { %v782_v32 = vpop.xlane.xlu1 %781 }
 0x637   :  { %v784_v33 = vsub.f32 %v776_v26, %v782_v32 }
 0x638   :  { %v779_v25 = vpop.xlane.xlu0 %778 }
 0x639   :  { %v783_v36 = vsub.f32 %v775_v30, %v779_v25  ;;  %v787_v37 = vmul.f32 1.442695, %v784_v33 }
 0x63a   :  { %v911_v38 = vpop.permute.xlu1 %910 }
 0x63b   :  { %v785_v39 = vmul.f32 1.442695, %v783_v36 }
 0x63c   :  { %v913_v34 = vpop.permute.xlu0 %912 }
 0x63d   :  { %1863 = vpow2.f32 %v785_v39  ;;  %1748 = vmatprep.subr.msk.mxu0 %vm442_vm2, %v913_v34 }
 0x63e   :  { %1865 = vpow2.f32 %v787_v37  ;;  %v907_v40 = vpop.permute.xlu1 %906 }
 0x640   :  { %v909_v41 = vpop.permute.xlu0 %908 }
 0x642   :  { %v903_v42 = vpop.permute.xlu1 %902 }
 0x644   :  { %v905_v43 = vpop.permute.xlu0 %904 }
 0x646   :  { %v901_v46 = vpop.permute.xlu1 %900 }
 0x648   :  { %v899_v50 = vpop.permute.xlu0 %898 }
 0x64a   :  { %v2264_v52 = vpop.eup %1863  ;;  %v1036_v55 = vpop.permute.xlu1 %1035 }
 0x64b   :  { %v2266_v54 = vpop.eup %1865  ;;  %1745 = vmatprep.mubr.msk.f32.mxu0 %vm538_vm3, %v2264_v52 }
 0x64c   :  { %1746 = vmatmul.mubr.msk.f32.vlgmr.msra.gmra.mxu0 %vm538_vm3, %v2266_v54  ;;  %v1038_v56 = vpop.permute.xlu0 %1037  ;;  %v792_v39 = vsel %vm538_vm3, %v2266_v54, 0.0 }
 0x64d   :  { %1749 = vmatpush3.xpose.msk.msra.mxu0 %vm442_vm2, %v913_v34  ;;  %1760 = vmatprep.mubr.msk.f32.mxu0 %vm442_vm2, %v899_v50 }
 0x64e   :  { %1750 = vmatprep.subr.msk.mxu0 %vm442_vm2, %v911_v38  ;;  %1763 = vmatprep.subr.mxu1 %v1038_v56  ;;  %v1032_v58 = vpop.permute.xlu1 %1031 }
 0x64f   :  { %1764 = vmatpush3.msra.mxu1 %v1038_v56 }
 0x650   :  { %1765 = vmatprep.subr.mxu1 %v1036_v55  ;;  %v1034_v57 = vpop.permute.xlu0 %1033 }
 0x651   :  { %1751 = vmatpush3.xpose.msk.msra.mxu0 %vm442_vm2, %v911_v38  ;;  %1766 = vmatpush3.msra.mxu1 %v1036_v55 }
 0x652   :  { %1752 = vmatprep.subr.msk.mxu0 %vm442_vm2, %v909_v41  ;;  %1767 = vmatprep.subr.mxu1 %v1034_v57  ;;  %v1028_v60 = vpop.permute.xlu1 %1027 }
 0x653   :  { %1768 = vmatpush3.msra.mxu1 %v1034_v57  ;;  %v554_v57 = vsel %vm538_vm3, %v2222_v8, 0.0 }
 0x654   :  { %1769 = vmatprep.subr.mxu1 %v1032_v58  ;;  %v1030_v59 = vpop.permute.xlu0 %1029 }
 0x655   :  { %1753 = vmatpush3.xpose.msk.msra.mxu0 %vm442_vm2, %v909_v41  ;;  %1770 = vmatpush3.msra.mxu1 %v1032_v58  ;;  %v551_v58 = vsel %vm538_vm3, %v2220_v7, 0.0 }
 0x656   :  { %1754 = vmatprep.subr.msk.mxu0 %vm442_vm2, %v907_v40  ;;  %1771 = vmatprep.subr.mxu1 %v1030_v59 }
 0x657   :  { %1772 = vmatpush3.msra.mxu1 %v1030_v59 }
 0x658   :  { %1773 = vmatprep.subr.mxu1 %v1028_v60 }
 0x659   :  { %1755 = vmatpush3.xpose.msk.msra.mxu0 %vm442_vm2, %v907_v40  ;;  %1774 = vmatpush3.msra.mxu1 %v1028_v60 }
 0x65a   :  { %1756 = vmatprep.subr.msk.mxu0 %vm442_vm2, %v905_v43 }
 0x65d   :  { %1757 = vmatpush3.xpose.msk.msra.mxu0 %vm442_vm2, %v905_v43 }
 0x65e   :  { %1758 = vmatprep.subr.msk.mxu0 %vm442_vm2, %v903_v42 }
 0x661   :  { %1759 = vmatpush3.xpose.msk.msra.mxu0 %vm442_vm2, %v903_v42 }
 0x664   :  { %1761 = vmatmul.mubr.msk.f32.vlgmr.msra.gmra.mxu0 %vm442_vm2, %v901_v46 }
 0x70c   :  { %v2285_v61 = vpop.f32.mrf.mxu0 }
 0x70e   :  { %v2287_v62 = vpop.f32.mrf.mxu0 }
 0x724   :  { %v1762_v63 = vpop.f32.mrf.mxu0 }
 0x725   :  { %v1006_v0 = vmul.f32 0.35355338, %v1762_v63 }
 0x726   :  { %v996_v1 = vpop.f32.mrf.mxu0 }
 0x727   :  { %v1005_v2 = vmul.f32 0.35355338, %v996_v1  ;;  %v1008_v3 = vadd.f32 %v1006_v0, %v2194_v35 }
 0x729   :  { %v1012_v4 = vsel %vm538_vm3, %v1008_v3, -inf  ;;  %v1007_v5 = vadd.f32 %v1005_v2, %v2199_v48 }
 0x72a   :  { %1013 = vmax.xlane.f32.xlu1 %v1012_v4 }
 0x72b   :  { %v1009_v6 = vsel %vm538_vm3, %v1007_v5, -inf }
 0x72c   :  { %1010 = vmax.xlane.f32.xlu0 %v1009_v6 }
 0x73b   :  { %1142 = vrot.lane.b32.xlu1 %v2151_v22, %s1921_s25 }
 0x73f   :  { %1138 = vrot.lane.b32.xlu1 %v2166_v28, %s1921_s25 }
 0x742   :  { %1144 = vrot.lane.b32.xlu0 %v2147_v16, %s1921_s25 }
 0x743   :  { %1134 = vrot.lane.b32.xlu1 %v2170_v29, %s1921_s25 }
 0x746   :  { %1140 = vrot.lane.b32.xlu0 %v2161_v27, %s1921_s25 }
 0x747   :  { %1132 = vrot.lane.b32.xlu1 %v2147_v16, %s1922_s26 }
 0x74a   :  { %1136 = vrot.lane.b32.xlu0 %v2157_v23, %s1921_s25 }
 0x74b   :  { %1267 = vrot.lane.b32.xlu1 %v2133_v53, %s1923_s27 }
 0x74e   :  { %1130 = vrot.lane.b32.xlu0 %v2151_v22, %s1922_s26 }
 0x74f   :  { %1263 = vrot.lane.b32.xlu1 %v2123_v49, %s1923_s27 }
 0x752   :  { %1269 = vrot.lane.b32.xlu0 %v2128_v51, %s1923_s27 }
 0x756   :  { %1265 = vrot.lane.b32.xlu0 %v2118_v47, %s1923_s27 }
 0x7b3   :  { %v1014_v27 = vpop.xlane.xlu1 %1013 }
 0x7b4   :  { %v1016_v28 = vsub.f32 %v1008_v3, %v1014_v27  ;;  %v1396_v27 = vld [vmem:[%s2388_s7 + $0x10] sm:$0xff] }
 0x7b5   :  { %v1011_v16 = vpop.xlane.xlu0 %1010 }
 0x7b6   :  { %v1015_v29 = vsub.f32 %v1007_v5, %v1011_v16  ;;  %v1019_v23 = vmul.f32 1.442695, %v1016_v28  ;;  %v1395_v16 = vld [vmem:[%s2388_s7 + $0x8] sm:$0xff] }
 0x7b7   :  { %v1143_v9 = vpop.permute.xlu1 %1142 }
 0x7b8   :  { %v1017_v10 = vmul.f32 1.442695, %v1015_v29  ;;  %v1394_v29 = vld [vmem:[%s2388_s7] sm:$0xff] }
 0x7b9   :  { %v1145_v11 = vpop.permute.xlu0 %1144 }
 0x7ba   :  { %1867 = vpow2.f32 %v1017_v10  ;;  %1778 = vmatprep.subr.msk.mxu1 %vm442_vm2, %v1145_v11 }
 0x7bb   :  { %1869 = vpow2.f32 %v1019_v23  ;;  %v1139_v53 = vpop.permute.xlu1 %1138 }
 0x7bd   :  { %v1141_v49 = vpop.permute.xlu0 %1140 }
 0x7bf   :  { %v1135_v22 = vpop.permute.xlu1 %1134 }
 0x7c1   :  { %v1137_v12 = vpop.permute.xlu0 %1136 }
 0x7c3   :  { %v1133_v51 = vpop.permute.xlu1 %1132 }
 0x7c5   :  { %v1131_v13 = vpop.permute.xlu0 %1130 }
 0x7c7   :  { %v1868_v14 = vpop.eup %1867  ;;  %v1268_v20 = vpop.permute.xlu1 %1267 }
 0x7c8   :  { %v1870_v47 = vpop.eup %1869  ;;  %1775 = vmatprep.mubr.msk.f32.mxu1 %vm538_vm3, %v1868_v14 }
 0x7c9   :  { %1776 = vmatmul.mubr.msk.f32.vlgmr.msra.gmra.mxu1 %vm538_vm3, %v1870_v47  ;;  %v1270_v19 = vpop.permute.xlu0 %1269  ;;  %v1024_v34 = vsel %vm538_vm3, %v1870_v47, 0.0 }
 0x7ca   :  { %1779 = vmatpush3.xpose.msk.msra.mxu1 %vm442_vm2, %v1145_v11  ;;  %1790 = vmatprep.mubr.msk.f32.mxu1 %vm442_vm2, %v1131_v13 }
 0x7cb   :  { %1780 = vmatprep.subr.msk.mxu1 %vm442_vm2, %v1143_v9  ;;  %1793 = vmatprep.subr.mxu0 %v1270_v19  ;;  %v1264_v24 = vpop.permute.xlu1 %1263 }
 0x7cc   :  { %1794 = vmatpush3.msra.mxu0 %v1270_v19 }
 0x7cd   :  { %1795 = vmatprep.subr.mxu0 %v1268_v20  ;;  %v1266_v21 = vpop.permute.xlu0 %1265 }
 0x7ce   :  { %1781 = vmatpush3.xpose.msk.msra.mxu1 %vm442_vm2, %v1143_v9  ;;  %1796 = vmatpush3.msra.mxu0 %v1268_v20 }
 0x7cf   :  { %1782 = vmatprep.subr.msk.mxu1 %vm442_vm2, %v1141_v49  ;;  %1797 = vmatprep.subr.mxu0 %v1266_v21 }
 0x7d0   :  { %1798 = vmatpush3.msra.mxu0 %v1266_v21 }
 0x7d1   :  { %1799 = vmatprep.subr.mxu0 %v1264_v24 }
 0x7d2   :  { %1783 = vmatpush3.xpose.msk.msra.mxu1 %vm442_vm2, %v1141_v49  ;;  %1800 = vmatpush3.msra.mxu0 %v1264_v24 }
 0x7d3   :  { %1784 = vmatprep.subr.msk.mxu1 %vm442_vm2, %v1139_v53 }
 0x7d6   :  { %1785 = vmatpush3.xpose.msk.msra.mxu1 %vm442_vm2, %v1139_v53 }
 0x7d7   :  { %1786 = vmatprep.subr.msk.mxu1 %vm442_vm2, %v1137_v12 }
 0x7da   :  { %1787 = vmatpush3.xpose.msk.msra.mxu1 %vm442_vm2, %v1137_v12 }
 0x7db   :  { %1788 = vmatprep.subr.msk.mxu1 %vm442_vm2, %v1135_v22 }
 0x7de   :  { %1789 = vmatpush3.xpose.msk.msra.mxu1 %vm442_vm2, %v1135_v22 }
 0x7e1   :  { %1791 = vmatmul.mubr.msk.f32.vlgmr.msra.gmra.mxu1 %vm442_vm2, %v1133_v51 }
 0x889   :  { %v2325_v26 = vpop.f32.mrf.mxu1 }
 0x88b   :  { %v2327_v17 = vpop.f32.mrf.mxu1 }
 0x8a1   :  { %v1792_v30 = vpop.f32.mrf.mxu1 }
 0x8a2   :  { %v1238_v31 = vmul.f32 0.35355338, %v1792_v30 }
 0x8a3   :  { %v1228_v32 = vpop.f32.mrf.mxu1 }
 0x8a4   :  { %v1237_v33 = vmul.f32 0.35355338, %v1228_v32  ;;  %v1240_v25 = vadd.f32 %v1238_v31, %v2194_v35  ;;  %v789_v35 = vsel %vm538_vm3, %v2264_v52, 0.0 }
 0x8a6   :  { %v1239_v36 = vadd.f32 %v1237_v33, %v2199_v48  ;;  %v1244_v37 = vsel %vm538_vm3, %v1240_v25, -inf  ;;  %v1021_v48 = vsel %vm538_vm3, %v1868_v14, 0.0 }
 0x8a7   :  { %1245 = vmax.xlane.f32.xlu1 %v1244_v37 }
 0x8a8   :  { %v1241_v38 = vsel %vm538_vm3, %v1239_v36, -inf }
 0x8a9   :  { %1242 = vmax.xlane.f32.xlu0 %v1241_v38 }
 0x8b8   :  { %1259 = vrot.lane.b32.xlu1 %v2114_v45, %s1923_s27 }
 0x8bf   :  { %1261 = vrot.lane.b32.xlu0 %v2112_v44, %s1923_s27 }
 0x8dc   :  { %793 = vadd.xlane.f32.xlu1 %v792_v39 }
 0x8de   :  { %790 = vadd.xlane.f32.xlu0 %v789_v35 }
 0x8e2   :  { %1022 = vadd.xlane.f32.xlu0 %v1021_v48 }
 0x8e6   :  { %1025 = vadd.xlane.f32.xlu0 %v1024_v34 }
 0x930   :  { %v1246_v40 = vpop.xlane.xlu1 %1245 }
 0x931   :  { %v1248_v41 = vsub.f32 %v1240_v25, %v1246_v40 }
 0x932   :  { %v1243_v45 = vpop.xlane.xlu0 %1242 }
 0x933   :  { %v1251_v42 = vmul.f32 1.442695, %v1248_v41  ;;  %v1247_v43 = vsub.f32 %v1239_v36, %v1243_v45 }
 0x934   :  { %v1260_v50 = vpop.permute.xlu1 %1259 }
 0x935   :  { %1871 = vpow2.f32 %v1251_v42  ;;  %v1249_v44 = vmul.f32 1.442695, %v1247_v43 }
 0x936   :  { %v1262_v46 = vpop.permute.xlu0 %1261 }
 0x937   :  { %1873 = vpow2.f32 %v1249_v44  ;;  %1801 = vmatprep.subr.mxu0 %v1262_v46 }
 0x938   :  { %1802 = vmatpush3.msra.mxu0 %v1262_v46 }
 0x939   :  { %1803 = vmatprep.subr.mxu0 %v1260_v50 }
 0x93a   :  { %1804 = vmatpush3.msra.mxu0 %v1260_v50 }
 0x942   :  { %v1872_v52 = vpop.eup %1871 }
 0x943   :  { %v1256_v54 = vsel %vm538_vm3, %v1872_v52, 0.0 }
 0x944   :  { %v1874_v55 = vpop.eup %1873  ;;  %1257 = vadd.xlane.f32.xlu1 %v1256_v54 }
 0x945   :  { %1805 = vmatprep.mubr.msk.f32.mxu0 %vm538_vm3, %v1874_v55  ;;  %v1253_v56 = vsel %vm538_vm3, %v1874_v55, 0.0 }
 0x946   :  { %1254 = vadd.xlane.f32.xlu0 %v1253_v56  ;;  %1806 = vmatmul.mubr.msk.f32.vlgmr.msra.gmra.mxu0 %vm538_vm3, %v1872_v52 }
 0x948   :  { %555 = vadd.xlane.f32.xlu1 %v554_v57 }
 0x94a   :  { %552 = vadd.xlane.f32.xlu0 %v551_v58 }
 0x965   :  { %v794_v59 = vpop.xlane.xlu1 %793 }
 0x966   :  { %1875 = vrcp.f32 %v794_v59 }
 0x967   :  { %v791_v60 = vpop.xlane.xlu0 %790 }
 0x968   :  { %1877 = vrcp.f32 %v791_v60 }
 0x96b   :  { %v1023_v63 = vpop.xlane.xlu0 %1022 }
 0x96c   :  { %1879 = vrcp.f32 %v1023_v63 }
 0x96f   :  { %v1026_v0 = vpop.xlane.xlu0 %1025 }
 0x970   :  { %1881 = vrcp.f32 %v1026_v0 }
 0x973   :  { %v1876_v1 = vpop.eup %1875 }
 0x974   :  { %v897_v2 = vmul.f32 %v1876_v1, %v2285_v61  ;;  %v1397_v61 = vld [vmem:[%s2388_s7 + $0x18] sm:$0xff]  ;;  %s1927_s7 = smov [#allocation2]  }
 0x975   :  { %v1878_v3 = vpop.eup %1877  ;;  %1808 = vmatprep.subr.mxu0 %v1397_v61  ;;  %s1486_s14 = sshll.u32 %s1927_s7, 4  ;;  %s1487_s14 = int_to_ptr.vmem [resolvable:$true] %s1486_s14 }
 0x976   :  { %1366 = vrot.lane.b32.xlu1 %v897_v2, %s1924_s28  ;;  %v895_v8 = vmul.f32 %v1878_v3, %v2287_v62  ;;  %1809 = vmatpush3.msra.mxu0 %v1397_v61  ;;  %s1891_s4 = scalar_lea.vmem %s1487_s14, 256  ;;  %p1896_p1 = scmp.lt.s32.totalorder %s1487_s14, %s1487_s14 }
 0x977   :  { %1810 = vmatprep.subr.mxu0 %v1396_v27  ;;  %p1892_p0 = scmp.ne.s32.totalorder %s1487_s14, %s1891_s4  ;;  %p1897_p2 = scmp.lt.s32.totalorder %s1891_s4, %s1891_s4 }
 0x978   :  { %1364 = vrot.lane.b32.xlu0 %v895_v8, %s1924_s28  ;;  %1811 = vmatpush3.msra.mxu0 %v1396_v27 }
 0x979   :  { %v1880_v7 = vpop.eup %1879  ;;  %1812 = vmatprep.subr.mxu0 %v1395_v16  ;;  %p1898_p3 = por %p1897_p2, %p1896_p1 }
 0x97a   :  { %v1127_v4 = vmul.f32 %v1880_v7, %v2327_v17  ;;  %1813 = vmatpush3.msra.mxu0 %v1395_v16 }
 0x97b   :  { %1814 = vmatprep.subr.mxu0 %v1394_v29  ;;  %p1899_p4 = pnand %p1898_p3, %p1892_p0 }
 0x97c   :  { %1372 = vrot.lane.b32.xlu1 %v1127_v4, %s1925_s29  ;;  %1815 = vmatpush3.msra.mxu0 %v1394_v29 }
 0x97d   :  { %v1882_v5 = vpop.eup %1881 }
 0x97e   :  { %v1129_v6 = vmul.f32 %v1882_v5, %v2325_v26 }
 0x980   :  { %1374 = vrot.lane.b32.xlu1 %v1129_v6, %s1925_s29 }
 0x9cd   :  { %v1258_v62 = vpop.xlane.xlu1 %1257 }
 0x9ce   :  { %1883 = vrcp.f32 %v1258_v62 }
 0x9cf   :  { %v1255_v28 = vpop.xlane.xlu0 %1254 }
 0x9d0   :  { %1885 = vrcp.f32 %v1255_v28 }
 0x9d1   :  { %v556_v12 = vpop.xlane.xlu1 %555 }
 0x9d3   :  { %v553_v22 = vpop.xlane.xlu0 %552 }
 0x9d4   :  { %1887 = vrcp.f32 %v553_v22 }
 0x9d5   :  { %1889 = vrcp.f32 %v556_v12 }
 0x9db   :  { %v1884_v23 = vpop.eup %1883 }
 0x9dd   :  { %v1886_v11 = vpop.eup %1885 }
 0x9e1   :  { %v1888_v14 = vpop.eup %1887 }
 0x9e2   :  { %v1890_v47 = vpop.eup %1889  ;;  %v663_v21 = vmul.f32 %v1888_v14, %v2243_v18 }
 0x9e3   :  { %v665_v24 = vmul.f32 %v1890_v47, %v2241_v15 }
 0x9e8   :  { %v1367_v51 = vpop.permute.xlu1 %1366 }
 0x9e9   :  { %v1387_v30 = vsel %vm442_vm2, %v665_v24, %v1367_v51 }
 0x9ea   :  { %v1365_v20 = vpop.permute.xlu0 %1364 }
 0x9eb   :  { %v1386_v26 = vsel %vm442_vm2, %v663_v21, %v1365_v20 }
 0x9ee   :  { %v1373_v13 = vpop.permute.xlu1 %1372 }
 0x9ef   :  { %v1389_v31 = vsel %vm1388_vm4, %v1386_v26, %v1373_v13 }
 0x9f2   :  { %v1375_v19 = vpop.permute.xlu1 %1374 }
 0x9f3   :  { %v1390_v33 = vsel %vm1388_vm4, %v1387_v30, %v1375_v19 }
 0xa06   :  { %v1807_v9 = vpop.f32.mrf.mxu0 }
 0xa07   :  { %v1361_v10 = vmul.f32 %v1884_v23, %v1807_v9 }
 0xa08   :  { %v1349_v53 = vpop.f32.mrf.mxu0 }
 0xa09   :  { %v1359_v49 = vmul.f32 %v1886_v11, %v1349_v53  ;;  %1382 = vrot.lane.b32.xlu1 %v1361_v10, %s1926_s2 }
 0xa0b   :  { %1380 = vrot.lane.b32.xlu0 %v1359_v49, %s1926_s2 }
 0xa7b   :  { %v1383_v17 = vpop.permute.xlu1 %1382 }
 0xa7c   :  { %v1393_v36 = vsel %vm1391_vm5, %v1390_v33, %v1383_v17 }
 0xa7d   :  { %v1381_v32 = vpop.permute.xlu0 %1380 }
 0xa7e   :  { %v1392_v25 = vsel %vm1391_vm5, %v1389_v31, %v1381_v32 }
 0xa7f   :  { %1816 = vmatprep.mubr.msk.f32.mxu0 %vm36_vm0, %v1392_v25 }
 0xa80   :  { %1817 = vmatmul.mubr.msk.f32.vlgmr.msra.gmra.mxu0 %vm36_vm0, %v1393_v36 }
 0xb40   :  { %v1818_v18 = vpop.f32.mrf.mxu0 }
 0xb41   :  { %1480 = vst.msk [vmem:[#allocation2 + $0x8] sm:$0xff] %vm36_vm0, %v1818_v18 }
 0xb42   :  { %v1470_v15 = vpop.f32.mrf.mxu0 }
 0xb43   :  { %1479 = vst.msk [vmem:[#allocation2] sm:$0xff] %vm36_vm0, %v1470_v15 }
 0xb44   :  { %1902 = shalt.err (!%p1899_p4)
}
 0xb45   :  { %s1928_s15 = smov 128  }
 0xb46   :  { %1492 = dma.vmem_to_hbm [thread:$0]  %s1487_s14, 256, %s2389_s8, [#allocation3], %s1928_s15, %s1928_s15, %s1924_s28  }
 0xb47   :  { %1911 = dma.done.wait [#allocation3], 256  }
 0xb48   :  { %1912 = vsyncadd [#allocation3], 4294967040 }
 0xb49   :  { %1496 = vsyncpa [#allocation3], 1 }

</bundles_post_ra>
